<compile_context>
chip_gen: v5e
topology: v5e:2x2
jax: 0.10.0
libtpu: 0.0.40
codegen_flags: <defaults>
</compile_context>

<pallas_src>
import jax
import jax.numpy as jnp
from jax.experimental import pallas as pl
from jax.experimental.pallas import tpu as pltpu


def _make_kernel(n_head, compute_dtype, with_attn):
    eps = 1e-6
    cdt = compute_dtype

    def kernel(dec_ref, kh_ref, vh_ref, bias_ref, npm_ref,
               wq_ref, wo_ref, ln1g_ref, ln1b_ref,
               w1_ref, b1_ref, w2_ref, b2_ref,
               ln2g_ref, ln2b_ref,
               *out_refs):
        out_ref = out_refs[0]
        attn_ref = out_refs[1] if with_attn else None

        x = dec_ref[0].astype(jnp.float32)        # (bq, D)
        kh = kh_ref[0]                            # (H, Lk, dk)  pre-projected K heads, cdt
        vh = vh_ref[0]                            # (H, Lk, dv)  pre-projected V heads, cdt
        bias = bias_ref[0].astype(jnp.float32)    # (bq, Lk)  additive mask bias (0 / -1e9)
        npm = npm_ref[0]                          # (bq, 1)   f32

        bq, dmodel = x.shape

        residual = x

        # ---- MultiHeadAttention: pre-norm LayerNorm on the query path (f32, single pass) ----
        xc = x - jnp.mean(x, axis=-1, keepdims=True)
        var = jnp.mean(xc * xc, axis=-1, keepdims=True)
        qn = xc * jax.lax.rsqrt(var + eps) * ln1g_ref[...] + ln1b_ref[...]

        # ---- Q head projection (1/sqrt(d_k) folded into wq on the host) ----
        qn_b = jnp.broadcast_to(qn.astype(cdt)[None], (n_head, bq, dmodel))
        qh = jnp.einsum('hqc,hcd->hqd', qn_b, wq_ref[...],
                        preferred_element_type=jnp.float32)       # (H, bq, dk)

        # ---- scores for all heads; mask applied as a precomputed additive bias ----
        s = jnp.einsum('hqd,hkd->hqk', qh.astype(cdt), kh,
                       preferred_element_type=jnp.float32)        # (H, bq, Lk)
        s = s + bias[None, :, :]

        # softmax in f32; reciprocal on the EUP + one Newton refinement (f32 accuracy)
        m = jnp.max(s, axis=-1, keepdims=True)
        e = jnp.exp(s - m)
        l = jnp.sum(e, axis=-1, keepdims=True)
        r = pl.reciprocal(l, approx=True)
        r = r * (2.0 - l * r)
        a = (e * r).astype(cdt)          # single cast reused by the store and the PV matmul
        if with_attn:
            attn_ref[0] = a.astype(attn_ref.dtype)    # single store, all heads

        # ---- context + output projection ----
        ctx = jnp.einsum('hqk,hkd->hqd', a, vh,
                         preferred_element_type=jnp.float32)      # (H, bq, dv)
        proj = jnp.einsum('hqd,hdc->hqc', ctx.astype(cdt), wo_ref[...],
                          preferred_element_type=jnp.float32)     # (H, bq, D)
        attn_out = (jnp.sum(proj, axis=0) + residual) * npm       # residual + non_pad_mask

        # ---- PositionwiseFeedForward (pre-norm, residual), LN in f32 single pass ----
        res2 = attn_out
        xc2 = attn_out - jnp.mean(attn_out, axis=-1, keepdims=True)
        var2 = jnp.mean(xc2 * xc2, axis=-1, keepdims=True)
        xn = xc2 * jax.lax.rsqrt(var2 + eps) * ln2g_ref[...] + ln2b_ref[...]
        h1 = jnp.maximum(
            jnp.dot(xn.astype(cdt), w1_ref[...],
                    preferred_element_type=jnp.float32) + b1_ref[...], 0.0)
        ff = jnp.dot(h1.astype(cdt), w2_ref[...],
                     preferred_element_type=jnp.float32) + b2_ref[...]
        out_ref[0] = ((ff + res2) * npm).astype(out_ref.dtype)

    return kernel


def _vmem_capacity_bytes():
    """Detected per-core VMEM capacity; falls back to 128 MiB (v5e/v6e) if query fails."""
    try:
        info = pltpu.get_tpu_info()
        return int(getattr(info, "vmem_capacity_bytes", 128 * 1024 * 1024))
    except Exception:
        return 128 * 1024 * 1024


def mod_decoder_layer(dec_input, k, v, non_pad_mask, slf_attn_mask, params,
                      *, n_head, d_k, d_v, compute_dtype=jnp.bfloat16,
                      block_q=None, return_attn=True):
    B, Lq, D = dec_input.shape
    Lk = k.shape[1]
    d_inner = params["w1"].shape[1]
    cdt = compute_dtype
    attn_dtype = cdt        # bf16 attn-probs writeback in the production path

    # --- generation-aware VMEM limit: ~48 MiB on 64 MiB parts (v7x), ~96 MiB on 128 MiB parts ---
    vmem_cap = _vmem_capacity_bytes()
    vmem_limit = min(int(vmem_cap * 0.75), 112 * 1024 * 1024)

    # --- block_q sized from a VMEM budget (live f32 score buffers + attn output buffers) ---
    if block_q is None:
        attn_itemsize = jnp.dtype(attn_dtype).itemsize if return_attn else 0

        def live_bytes(bq):
            score = 3 * n_head * bq * Lk * 4                 # s / e / a-sized f32 buffers
            attn_out = 2 * n_head * bq * Lk * attn_itemsize  # attn output double buffer
            return score + attn_out

        budget = int(vmem_limit * 0.35)
        divisors = [c for c in (512, 256, 128, 64, 32, 16, 8) if Lq % c == 0]
        if divisors:
            block_q = next((c for c in divisors if live_bytes(c) <= budget), divisors[-1])
        else:
            block_q = Lq
    assert Lq % block_q == 0
    nq = Lq // block_q

    # --- host-side layout plumbing / hoisted per-call work (done once, not per q tile) ---
    temperature = d_k ** 0.5
    wq_r = (params["wq"] / temperature).reshape(D, n_head, d_k).transpose(1, 0, 2).astype(cdt)
    wo_r = params["wo"].reshape(n_head, d_v, D).astype(cdt)
    w1 = params["w1"].astype(cdt)
    w2 = params["w2"].astype(cdt)
    # K/V head projections hoisted out of the kernel (identical for every q tile).
    kh = (k @ params["wk"]).reshape(B, Lk, n_head, d_k).transpose(0, 2, 1, 3).astype(cdt)
    vh = (v @ params["wv"]).reshape(B, Lk, n_head, d_v).transpose(0, 2, 1, 3).astype(cdt)
    # Additive mask bias: 0 where mask==1, -1e9 where mask==0 (no equality test in-kernel).
    bias = ((slf_attn_mask - 1.0) * 1e9).astype(cdt)
    npm = non_pad_mask.astype(jnp.float32)

    kernel = _make_kernel(n_head, cdt, return_attn)

    wbuf = pl.Buffered(1)   # constant-index weights: single VMEM buffer, DMA'd once

    bq_map = lambda b, q: (b, q, 0)
    kv_map = lambda b, q: (b, 0, 0, 0)
    c3 = lambda b, q: (0, 0, 0)
    c2 = lambda b, q: (0, 0)

    in_specs = [
        pl.BlockSpec((1, block_q, D), bq_map),                       # dec_input
        pl.BlockSpec((1, n_head, Lk, d_k), kv_map),                  # pre-projected K heads
        pl.BlockSpec((1, n_head, Lk, d_v), kv_map),                  # pre-projected V heads
        pl.BlockSpec((1, block_q, Lk), bq_map),                      # additive mask bias
        pl.BlockSpec((1, block_q, 1), bq_map),                       # non_pad_mask
        pl.BlockSpec((n_head, D, d_k), c3, pipeline_mode=wbuf),      # wq slabs (pre-scaled)
        pl.BlockSpec((n_head, d_v, D), c3, pipeline_mode=wbuf),      # wo slabs
        pl.BlockSpec((1, D), c2, pipeline_mode=wbuf),                # ln1 gamma
        pl.BlockSpec((1, D), c2, pipeline_mode=wbuf),                # ln1 beta
        pl.BlockSpec((D, d_inner), c2, pipeline_mode=wbuf),          # w1
        pl.BlockSpec((1, d_inner), c2, pipeline_mode=wbuf),          # b1
        pl.BlockSpec((d_inner, D), c2, pipeline_mode=wbuf),          # w2
        pl.BlockSpec((1, D), c2, pipeline_mode=wbuf),                # b2
        pl.BlockSpec((1, D), c2, pipeline_mode=wbuf),                # ln2 gamma
        pl.BlockSpec((1, D), c2, pipeline_mode=wbuf),                # ln2 beta
    ]

    if return_attn:
        out_specs = (pl.BlockSpec((1, block_q, D), bq_map),
                     pl.BlockSpec((1, n_head, block_q, Lk), lambda b, q: (b, 0, q, 0)))
        out_shape = (jax.ShapeDtypeStruct((B, Lq, D), dec_input.dtype),
                     jax.ShapeDtypeStruct((B, n_head, Lq, Lk), attn_dtype))
    else:
        out_specs = pl.BlockSpec((1, block_q, D), bq_map)
        out_shape = jax.ShapeDtypeStruct((B, Lq, D), dec_input.dtype)

    return pl.pallas_call(
        kernel,
        out_shape=out_shape,
        grid_spec=pltpu.PrefetchScalarGridSpec(
            num_scalar_prefetch=0,
            grid=(B, nq),
            in_specs=in_specs,
            out_specs=out_specs,
        ),
        compiler_params=pltpu.CompilerParams(
            dimension_semantics=("parallel", "parallel"),
            vmem_limit_bytes=vmem_limit,
        ),
    )(dec_input, kh, vh, bias, npm,
      wq_r, wo_r, params["ln1_g"], params["ln1_b"],
      w1, params["b1"], w2, params["b2"],
      params["ln2_g"], params["ln2_b"])


def _reference(dec_input, k, v, non_pad_mask, mask, params, *, n_head, d_k, d_v):
    """Pure-JAX f32 reference mirroring the PyTorch forward (eval mode)."""
    eps = 1e-6

    def ln(x, g, b):
        mu = jnp.mean(x, -1, keepdims=True)
        var = jnp.mean((x - mu) ** 2, -1, keepdims=True)
        return (x - mu) / jnp.sqrt(var + eps) * g + b

    B, Lq, D = dec_input.shape
    Lk = k.shape[1]
    residual = dec_input
    qn = ln(dec_input, params["ln1_g"][0], params["ln1_b"][0])
    q = (qn @ params["wq"]).reshape(B, Lq, n_head, d_k).transpose(0, 2, 1, 3)
    kk = (k @ params["wk"]).reshape(B, Lk, n_head, d_k).transpose(0, 2, 1, 3)
    vv = (v @ params["wv"]).reshape(B, Lk, n_head, d_v).transpose(0, 2, 1, 3)
    s = jnp.einsum("bhqd,bhkd->bhqk", q / (d_k ** 0.5), kk)
    s = jnp.where(mask[:, None] == 0, -1e9, s)
    a = jax.nn.softmax(s, -1)
    ctx = jnp.einsum("bhqk,bhkd->bhqd", a, vv).transpose(0, 2, 1, 3).reshape(B, Lq, n_head * d_v)
    out = ctx @ params["wo"] + residual
    out = out * non_pad_mask
    res2 = out
    xn = ln(out, params["ln2_g"][0], params["ln2_b"][0])
    ff = jnp.maximum(xn @ params["w1"] + params["b1"][0], 0.0) @ params["w2"] + params["b2"][0]
    y = (ff + res2) * non_pad_mask
    return y, a


if __name__ == "__main__":
    # small, module-consistent shapes
    B, Lq, Lk = 2, 8, 8
    d_model, d_inner = 32, 64
    n_head, d_k, d_v = 4, 8, 8

    key = jax.random.PRNGKey(0)
    ks = jax.random.split(key, 16)
    f32 = jnp.float32

    dec_input = jax.random.normal(ks[0], (B, Lq, d_model), f32)
    k_in = jax.random.normal(ks[1], (B, Lk, d_model), f32)
    v_in = jax.random.normal(ks[2], (B, Lk, d_model), f32)

    # causal self-attention mask (1 = keep, 0 = masked) and a non-pad mask with some padding
    slf_attn_mask = jnp.tril(jnp.ones((Lq, Lk), f32))[None].repeat(B, axis=0)
    non_pad_mask = jnp.ones((B, Lq, 1), f32).at[1, -2:, :].set(0.0)

    params = {
        "wq": 0.1 * jax.random.normal(ks[3], (d_model, n_head * d_k), f32),
        "wk": 0.1 * jax.random.normal(ks[4], (d_model, n_head * d_k), f32),
        "wv": 0.1 * jax.random.normal(ks[5], (d_model, n_head * d_v), f32),
        "wo": 0.1 * jax.random.normal(ks[6], (n_head * d_v, d_model), f32),
        "ln1_g": jnp.ones((1, d_model), f32),
        "ln1_b": jnp.zeros((1, d_model), f32),
        "w1": 0.1 * jax.random.normal(ks[7], (d_model, d_inner), f32),
        "b1": 0.1 * jax.random.normal(ks[8], (1, d_inner), f32),
        "w2": 0.1 * jax.random.normal(ks[9], (d_inner, d_model), f32),
        "b2": 0.1 * jax.random.normal(ks[10], (1, d_model), f32),
        "ln2_g": jnp.ones((1, d_model), f32),
        "ln2_b": jnp.zeros((1, d_model), f32),
    }

    ref_out, ref_attn = _reference(
        dec_input, k_in, v_in, non_pad_mask, slf_attn_mask, params,
        n_head=n_head, d_k=d_k, d_v=d_v)

    # strict check: f32 compute path against the f32 reference
    dec_out, attn = mod_decoder_layer(
        dec_input, k_in, v_in, non_pad_mask, slf_attn_mask, params,
        n_head=n_head, d_k=d_k, d_v=d_v, compute_dtype=jnp.float32)
    jax.block_until_ready((dec_out, attn))
    assert dec_out.shape == (B, Lq, d_model) and attn.shape == (B, n_head, Lq, Lk)
    assert jnp.allclose(dec_out, ref_out, atol=1e-4, rtol=1e-4)
    assert jnp.allclose(attn, ref_attn, atol=1e-4, rtol=1e-4)

    # production path: bf16 MXU operands (f32 accumulation, f32 LN/softmax), bf16 attn probs
    dec_out_bf, attn_bf = mod_decoder_layer(
        dec_input, k_in, v_in, non_pad_mask, slf_attn_mask, params,
        n_head=n_head, d_k=d_k, d_v=d_v, compute_dtype=jnp.bfloat16)
    jax.block_until_ready((dec_out_bf, attn_bf))
    assert jnp.allclose(dec_out_bf, ref_out, atol=5e-2, rtol=5e-2)
    assert jnp.allclose(attn_bf.astype(f32), ref_attn, atol=3e-2, rtol=3e-2)

    # attention-probabilities output can be dropped entirely (removes the largest HBM writeback)
    dec_out_na = mod_decoder_layer(
        dec_input, k_in, v_in, non_pad_mask, slf_attn_mask, params,
        n_head=n_head, d_k=d_k, d_v=d_v, compute_dtype=jnp.bfloat16, return_attn=False)
    jax.block_until_ready(dec_out_na)
    assert jnp.allclose(dec_out_na, ref_out, atol=5e-2, rtol=5e-2)

    print("KERNEL_OK")
</pallas_src>

<mosaic_0001>
module attributes {stable_mosaic.version = 11 : i64} {
  func.func @kernel(%arg0: i32, %arg1: i32, %arg2: memref<1x8x32xf32, #tpu.memory_space<vmem>>, %arg3: memref<1x4x8x8xf32, #tpu.memory_space<vmem>>, %arg4: memref<1x4x8x8xf32, #tpu.memory_space<vmem>>, %arg5: memref<1x8x8xf32, #tpu.memory_space<vmem>>, %arg6: memref<1x8x1xf32, #tpu.memory_space<vmem>>, %arg7: memref<4x32x8xf32, #tpu.memory_space<vmem>>, %arg8: memref<4x8x32xf32, #tpu.memory_space<vmem>>, %arg9: memref<1x32xf32, #tpu.memory_space<vmem>>, %arg10: memref<1x32xf32, #tpu.memory_space<vmem>>, %arg11: memref<32x64xf32, #tpu.memory_space<vmem>>, %arg12: memref<1x64xf32, #tpu.memory_space<vmem>>, %arg13: memref<64x32xf32, #tpu.memory_space<vmem>>, %arg14: memref<1x32xf32, #tpu.memory_space<vmem>>, %arg15: memref<1x32xf32, #tpu.memory_space<vmem>>, %arg16: memref<1x32xf32, #tpu.memory_space<vmem>>, %arg17: memref<1x8x32xf32, #tpu.memory_space<vmem>>, %arg18: memref<1x4x8x8xf32, #tpu.memory_space<vmem>>) attributes {dimension_semantics = [#tpu.dimension_semantics<parallel>, #tpu.dimension_semantics<parallel>], iteration_bounds = array<i64: 2, 1>, scalar_prefetch = 0 : i64, scratch_operands = 0 : i64, tpu.core_type = #tpu.core_type<tc>, window_params = [{transform_indices = @transform_0, window_bounds = array<i64: 1, 8, 32>}, {transform_indices = @transform_1, window_bounds = array<i64: 1, 4, 8, 8>}, {transform_indices = @transform_2, window_bounds = array<i64: 1, 4, 8, 8>}, {transform_indices = @transform_3, window_bounds = array<i64: 1, 8, 8>}, {transform_indices = @transform_4, window_bounds = array<i64: 1, 8, 1>}, {pipeline_mode = #tpu.pipeline_mode<synchronous>, transform_indices = @transform_5, window_bounds = array<i64: 4, 32, 8>}, {pipeline_mode = #tpu.pipeline_mode<synchronous>, transform_indices = @transform_6, window_bounds = array<i64: 4, 8, 32>}, {pipeline_mode = #tpu.pipeline_mode<synchronous>, transform_indices = @transform_7, window_bounds = array<i64: 1, 32>}, {pipeline_mode = #tpu.pipeline_mode<synchronous>, transform_indices = @transform_8, window_bounds = array<i64: 1, 32>}, {pipeline_mode = #tpu.pipeline_mode<synchronous>, transform_indices = @transform_9, window_bounds = array<i64: 32, 64>}, {pipeline_mode = #tpu.pipeline_mode<synchronous>, transform_indices = @transform_10, window_bounds = array<i64: 1, 64>}, {pipeline_mode = #tpu.pipeline_mode<synchronous>, transform_indices = @transform_11, window_bounds = array<i64: 64, 32>}, {pipeline_mode = #tpu.pipeline_mode<synchronous>, transform_indices = @transform_12, window_bounds = array<i64: 1, 32>}, {pipeline_mode = #tpu.pipeline_mode<synchronous>, transform_indices = @transform_13, window_bounds = array<i64: 1, 32>}, {pipeline_mode = #tpu.pipeline_mode<synchronous>, transform_indices = @transform_14, window_bounds = array<i64: 1, 32>}, {transform_indices = @transform_15, window_bounds = array<i64: 1, 8, 32>}, {transform_indices = @transform_16, window_bounds = array<i64: 1, 4, 8, 8>}]} {
    %c0 = arith.constant 0 : index
    %c0_0 = arith.constant 0 : index
    %c0_1 = arith.constant 0 : index
    %0 = vector.load %arg2[%c0, %c0_0, %c0_1] : memref<1x8x32xf32, #tpu.memory_space<vmem>>, vector<1x8x32xf32>
    %1 = vector.shape_cast %0 : vector<1x8x32xf32> to vector<8x32xf32>
    %c0_2 = arith.constant 0 : index
    %c0_3 = arith.constant 0 : index
    %c0_4 = arith.constant 0 : index
    %c0_5 = arith.constant 0 : index
    %2 = vector.load %arg3[%c0_2, %c0_3, %c0_4, %c0_5] : memref<1x4x8x8xf32, #tpu.memory_space<vmem>>, vector<1x4x8x8xf32>
    %3 = vector.shape_cast %2 : vector<1x4x8x8xf32> to vector<4x8x8xf32>
    %c0_6 = arith.constant 0 : index
    %c0_7 = arith.constant 0 : index
    %c0_8 = arith.constant 0 : index
    %c0_9 = arith.constant 0 : index
    %4 = vector.load %arg4[%c0_6, %c0_7, %c0_8, %c0_9] : memref<1x4x8x8xf32, #tpu.memory_space<vmem>>, vector<1x4x8x8xf32>
    %5 = vector.shape_cast %4 : vector<1x4x8x8xf32> to vector<4x8x8xf32>
    %c0_10 = arith.constant 0 : index
    %c0_11 = arith.constant 0 : index
    %c0_12 = arith.constant 0 : index
    %6 = vector.load %arg5[%c0_10, %c0_11, %c0_12] : memref<1x8x8xf32, #tpu.memory_space<vmem>>, vector<1x8x8xf32>
    %7 = vector.shape_cast %6 : vector<1x8x8xf32> to vector<8x8xf32>
    %c0_13 = arith.constant 0 : index
    %c0_14 = arith.constant 0 : index
    %c0_15 = arith.constant 0 : index
    %8 = vector.load %arg6[%c0_13, %c0_14, %c0_15] : memref<1x8x1xf32, #tpu.memory_space<vmem>>, vector<1x8x1xf32>
    %9 = vector.shape_cast %8 : vector<1x8x1xf32> to vector<8x1xf32>
    %cst = arith.constant dense<0.000000e+00> : vector<8xf32>
    %10 = vector.multi_reduction <add>, %1, %cst [1] : vector<8x32xf32> to vector<8xf32>
    %11 = vector.shape_cast %10 : vector<8xf32> to vector<8x1xf32>
    %cst_16 = arith.constant 3.200000e+01 : f32
    %12 = vector.broadcast %cst_16 : f32 to vector<8x1xf32>
    %13 = arith.divf %11, %12 : vector<8x1xf32>
    %14 = vector.broadcast %13 : vector<8x1xf32> to vector<8x32xf32>
    %15 = arith.subf %1, %14 : vector<8x32xf32>
    %16 = arith.mulf %15, %15 : vector<8x32xf32>
    %cst_17 = arith.constant dense<0.000000e+00> : vector<8xf32>
    %17 = vector.multi_reduction <add>, %16, %cst_17 [1] : vector<8x32xf32> to vector<8xf32>
    %18 = vector.shape_cast %17 : vector<8xf32> to vector<8x1xf32>
    %cst_18 = arith.constant 3.200000e+01 : f32
    %19 = vector.broadcast %cst_18 : f32 to vector<8x1xf32>
    %20 = arith.divf %18, %19 : vector<8x1xf32>
    %cst_19 = arith.constant 9.99999997E-7 : f32
    %21 = vector.broadcast %cst_19 : f32 to vector<8x1xf32>
    %22 = arith.addf %20, %21 : vector<8x1xf32>
    %23 = math.rsqrt %22 : vector<8x1xf32>
    %24 = vector.broadcast %23 : vector<8x1xf32> to vector<8x32xf32>
    %25 = arith.mulf %15, %24 : vector<8x32xf32>
    %c0_20 = arith.constant 0 : index
    %c0_21 = arith.constant 0 : index
    %26 = vector.load %arg9[%c0_20, %c0_21] : memref<1x32xf32, #tpu.memory_space<vmem>>, vector<1x32xf32>
    %27 = vector.broadcast %26 : vector<1x32xf32> to vector<8x32xf32>
    %28 = arith.mulf %25, %27 : vector<8x32xf32>
    %c0_22 = arith.constant 0 : index
    %c0_23 = arith.constant 0 : index
    %29 = vector.load %arg10[%c0_22, %c0_23] : memref<1x32xf32, #tpu.memory_space<vmem>>, vector<1x32xf32>
    %30 = vector.broadcast %29 : vector<1x32xf32> to vector<8x32xf32>
    %31 = arith.addf %28, %30 : vector<8x32xf32>
    %32 = vector.shape_cast %31 : vector<8x32xf32> to vector<1x8x32xf32>
    %33 = vector.shape_cast %32 : vector<1x8x32xf32> to vector<1x8x32xf32>
    %34 = vector.broadcast %33 : vector<1x8x32xf32> to vector<4x8x32xf32>
    %c0_24 = arith.constant 0 : index
    %c0_25 = arith.constant 0 : index
    %c0_26 = arith.constant 0 : index
    %35 = vector.load %arg7[%c0_24, %c0_25, %c0_26] : memref<4x32x8xf32, #tpu.memory_space<vmem>>, vector<4x32x8xf32>
    "tpu.trace_start"() <{level = 10 : i32, message = "hqc,hcd->hqd"}> : () -> ()
    %cst_27 = arith.constant dense<0.000000e+00> : vector<4x8x8xf32>
    %36 = tpu.matmul %34, %35, %cst_27 {dimension_numbers = #tpu.dot_dimension_numbers<[2], [1], [1], [2], [0, 0, 0, 1, 1, 2], [0], [0]>} : vector<4x8x32xf32>, vector<4x32x8xf32>, vector<4x8x8xf32> -> vector<4x8x8xf32>
    "tpu.trace_stop"() : () -> ()
    "tpu.trace_start"() <{level = 10 : i32, message = "hqd,hkd->hqk"}> : () -> ()
    %cst_28 = arith.constant dense<0.000000e+00> : vector<4x8x8xf32>
    %37 = tpu.matmul %36, %3, %cst_28 {dimension_numbers = #tpu.dot_dimension_numbers<[2], [2], [1], [1], [0, 0, 0, 1, 1, 1], [0], [0]>} : vector<4x8x8xf32>, vector<4x8x8xf32>, vector<4x8x8xf32> -> vector<4x8x8xf32>
    "tpu.trace_stop"() : () -> ()
    %38 = vector.shape_cast %7 : vector<8x8xf32> to vector<1x8x8xf32>
    %39 = vector.broadcast %38 : vector<1x8x8xf32> to vector<4x8x8xf32>
    %40 = arith.addf %37, %39 : vector<4x8x8xf32>
    %cst_29 = arith.constant dense<0xFF800000> : vector<4x8xf32>
    %41 = vector.multi_reduction <maximumf>, %40, %cst_29 [2] : vector<4x8x8xf32> to vector<4x8xf32>
    %42 = vector.shape_cast %41 : vector<4x8xf32> to vector<4x8x1xf32>
    %43 = vector.broadcast %42 : vector<4x8x1xf32> to vector<4x8x8xf32>
    %44 = arith.subf %40, %43 : vector<4x8x8xf32>
    %45 = math.exp %44 : vector<4x8x8xf32>
    %cst_30 = arith.constant dense<0.000000e+00> : vector<4x8xf32>
    %46 = vector.multi_reduction <add>, %45, %cst_30 [2] : vector<4x8x8xf32> to vector<4x8xf32>
    %47 = vector.shape_cast %46 : vector<4x8xf32> to vector<4x8x1xf32>
    %48 = tpu.reciprocal %47 {approx = true} : vector<4x8x1xf32> -> vector<4x8x1xf32>
    %49 = arith.mulf %47, %48 : vector<4x8x1xf32>
    %cst_31 = arith.constant 2.000000e+00 : f32
    %50 = vector.broadcast %cst_31 : f32 to vector<4x8x1xf32>
    %51 = arith.subf %50, %49 : vector<4x8x1xf32>
    %52 = arith.mulf %48, %51 : vector<4x8x1xf32>
    %53 = vector.broadcast %52 : vector<4x8x1xf32> to vector<4x8x8xf32>
    %54 = arith.mulf %45, %53 : vector<4x8x8xf32>
    %c0_32 = arith.constant 0 : index
    %c0_33 = arith.constant 0 : index
    %c0_34 = arith.constant 0 : index
    %c0_35 = arith.constant 0 : index
    %55 = vector.load %arg18[%c0_32, %c0_33, %c0_34, %c0_35] : memref<1x4x8x8xf32, #tpu.memory_space<vmem>>, vector<1x4x8x8xf32>
    %56 = vector.shape_cast %55 : vector<1x4x8x8xf32> to vector<4x8x8xf32>
    %57 = vector.shape_cast %54 : vector<4x8x8xf32> to vector<1x4x8x8xf32>
    tpu.vector_store %arg18[%c0_32, %c0_33, %c0_34, %c0_35], %57 {strides = array<i32>} : memref<1x4x8x8xf32, #tpu.memory_space<vmem>>, vector<1x4x8x8xf32>,
    "tpu.trace_start"() <{level = 10 : i32, message = "hqk,hkd->hqd"}> : () -> ()
    %cst_36 = arith.constant dense<0.000000e+00> : vector<4x8x8xf32>
    %58 = tpu.matmul %54, %5, %cst_36 {dimension_numbers = #tpu.dot_dimension_numbers<[2], [1], [1], [2], [0, 0, 0, 1, 1, 2], [0], [0]>} : vector<4x8x8xf32>, vector<4x8x8xf32>, vector<4x8x8xf32> -> vector<4x8x8xf32>
    "tpu.trace_stop"() : () -> ()
    %c0_37 = arith.constant 0 : index
    %c0_38 = arith.constant 0 : index
    %c0_39 = arith.constant 0 : index
    %59 = vector.load %arg8[%c0_37, %c0_38, %c0_39] : memref<4x8x32xf32, #tpu.memory_space<vmem>>, vector<4x8x32xf32>
    "tpu.trace_start"() <{level = 10 : i32, message = "hqd,hdc->hqc"}> : () -> ()
    %cst_40 = arith.constant dense<0.000000e+00> : vector<4x8x32xf32>
    %60 = tpu.matmul %58, %59, %cst_40 {dimension_numbers = #tpu.dot_dimension_numbers<[2], [1], [1], [2], [0, 0, 0, 1, 1, 2], [0], [0]>} : vector<4x8x8xf32>, vector<4x8x32xf32>, vector<4x8x32xf32> -> vector<4x8x32xf32>
    "tpu.trace_stop"() : () -> ()
    %cst_41 = arith.constant dense<0.000000e+00> : vector<8x32xf32>
    %61 = vector.multi_reduction <add>, %60, %cst_41 [0] : vector<4x8x32xf32> to vector<8x32xf32>
    %62 = arith.addf %61, %1 : vector<8x32xf32>
    %63 = vector.broadcast %9 : vector<8x1xf32> to vector<8x32xf32>
    %64 = arith.mulf %62, %63 : vector<8x32xf32>
    %cst_42 = arith.constant dense<0.000000e+00> : vector<8xf32>
    %65 = vector.multi_reduction <add>, %64, %cst_42 [1] : vector<8x32xf32> to vector<8xf32>
    %66 = vector.shape_cast %65 : vector<8xf32> to vector<8x1xf32>
    %cst_43 = arith.constant 3.200000e+01 : f32
    %67 = vector.broadcast %cst_43 : f32 to vector<8x1xf32>
    %68 = arith.divf %66, %67 : vector<8x1xf32>
    %69 = vector.broadcast %68 : vector<8x1xf32> to vector<8x32xf32>
    %70 = arith.subf %64, %69 : vector<8x32xf32>
    %71 = arith.mulf %70, %70 : vector<8x32xf32>
    %cst_44 = arith.constant dense<0.000000e+00> : vector<8xf32>
    %72 = vector.multi_reduction <add>, %71, %cst_44 [1] : vector<8x32xf32> to vector<8xf32>
    %73 = vector.shape_cast %72 : vector<8xf32> to vector<8x1xf32>
    %cst_45 = arith.constant 3.200000e+01 : f32
    %74 = vector.broadcast %cst_45 : f32 to vector<8x1xf32>
    %75 = arith.divf %73, %74 : vector<8x1xf32>
    %cst_46 = arith.constant 9.99999997E-7 : f32
    %76 = vector.broadcast %cst_46 : f32 to vector<8x1xf32>
    %77 = arith.addf %75, %76 : vector<8x1xf32>
    %78 = math.rsqrt %77 : vector<8x1xf32>
    %79 = vector.broadcast %78 : vector<8x1xf32> to vector<8x32xf32>
    %80 = arith.mulf %70, %79 : vector<8x32xf32>
    %c0_47 = arith.constant 0 : index
    %c0_48 = arith.constant 0 : index
    %81 = vector.load %arg15[%c0_47, %c0_48] : memref<1x32xf32, #tpu.memory_space<vmem>>, vector<1x32xf32>
    %82 = vector.broadcast %81 : vector<1x32xf32> to vector<8x32xf32>
    %83 = arith.mulf %80, %82 : vector<8x32xf32>
    %c0_49 = arith.constant 0 : index
    %c0_50 = arith.constant 0 : index
    %84 = vector.load %arg16[%c0_49, %c0_50] : memref<1x32xf32, #tpu.memory_space<vmem>>, vector<1x32xf32>
    %85 = vector.broadcast %84 : vector<1x32xf32> to vector<8x32xf32>
    %86 = arith.addf %83, %85 : vector<8x32xf32>
    %c0_51 = arith.constant 0 : index
    %c0_52 = arith.constant 0 : index
    %87 = vector.load %arg11[%c0_51, %c0_52] : memref<32x64xf32, #tpu.memory_space<vmem>>, vector<32x64xf32>
    %cst_53 = arith.constant dense<0.000000e+00> : vector<8x64xf32>
    %88 = tpu.matmul %86, %87, %cst_53 {dimension_numbers = #tpu.dot_dimension_numbers<[1], [0], [0], [1], [0, 0, 1, 1], [], []>} : vector<8x32xf32>, vector<32x64xf32>, vector<8x64xf32> -> vector<8x64xf32>
    %c0_54 = arith.constant 0 : index
    %c0_55 = arith.constant 0 : index
    %89 = vector.load %arg12[%c0_54, %c0_55] : memref<1x64xf32, #tpu.memory_space<vmem>>, vector<1x64xf32>
    %90 = vector.broadcast %89 : vector<1x64xf32> to vector<8x64xf32>
    %91 = arith.addf %88, %90 : vector<8x64xf32>
    %cst_56 = arith.constant 0.000000e+00 : f32
    %92 = vector.broadcast %cst_56 : f32 to vector<8x64xf32>
    %93 = arith.maximumf %91, %92 : vector<8x64xf32>
    %c0_57 = arith.constant 0 : index
    %c0_58 = arith.constant 0 : index
    %94 = vector.load %arg13[%c0_57, %c0_58] : memref<64x32xf32, #tpu.memory_space<vmem>>, vector<64x32xf32>
    %cst_59 = arith.constant dense<0.000000e+00> : vector<8x32xf32>
    %95 = tpu.matmul %93, %94, %cst_59 {dimension_numbers = #tpu.dot_dimension_numbers<[1], [0], [0], [1], [0, 0, 1, 1], [], []>} : vector<8x64xf32>, vector<64x32xf32>, vector<8x32xf32> -> vector<8x32xf32>
    %c0_60 = arith.constant 0 : index
    %c0_61 = arith.constant 0 : index
    %96 = vector.load %arg14[%c0_60, %c0_61] : memref<1x32xf32, #tpu.memory_space<vmem>>, vector<1x32xf32>
    %97 = vector.broadcast %96 : vector<1x32xf32> to vector<8x32xf32>
    %98 = arith.addf %95, %97 : vector<8x32xf32>
    %99 = arith.addf %98, %64 : vector<8x32xf32>
    %100 = vector.broadcast %9 : vector<8x1xf32> to vector<8x32xf32>
    %101 = arith.mulf %99, %100 : vector<8x32xf32>
    %c0_62 = arith.constant 0 : index
    %c0_63 = arith.constant 0 : index
    %c0_64 = arith.constant 0 : index
    %102 = vector.load %arg17[%c0_62, %c0_63, %c0_64] : memref<1x8x32xf32, #tpu.memory_space<vmem>>, vector<1x8x32xf32>
    %103 = vector.shape_cast %102 : vector<1x8x32xf32> to vector<8x32xf32>
    %104 = vector.shape_cast %101 : vector<8x32xf32> to vector<1x8x32xf32>
    tpu.vector_store %arg17[%c0_62, %c0_63, %c0_64], %104 {strides = array<i32>} : memref<1x8x32xf32, #tpu.memory_space<vmem>>, vector<1x8x32xf32>,
    return
  }
  func.func @transform_0(%arg0: i32, %arg1: i32) -> (i32, i32, i32) {
    %c0_i32 = arith.constant 0 : i32
    %c0_i32_0 = arith.constant 0 : i32
    return %arg0, %arg1, %c0_i32 : i32, i32, i32
  }
  func.func @transform_1(%arg0: i32, %arg1: i32) -> (i32, i32, i32, i32) {
    %c0_i32 = arith.constant 0 : i32
    %c0_i32_0 = arith.constant 0 : i32
    %c0_i32_1 = arith.constant 0 : i32
    %c0_i32_2 = arith.constant 0 : i32
    return %arg0, %c0_i32, %c0_i32_0, %c0_i32_1 : i32, i32, i32, i32
  }
  func.func @transform_2(%arg0: i32, %arg1: i32) -> (i32, i32, i32, i32) {
    %c0_i32 = arith.constant 0 : i32
    %c0_i32_0 = arith.constant 0 : i32
    %c0_i32_1 = arith.constant 0 : i32
    %c0_i32_2 = arith.constant 0 : i32
    return %arg0, %c0_i32, %c0_i32_0, %c0_i32_1 : i32, i32, i32, i32
  }
  func.func @transform_3(%arg0: i32, %arg1: i32) -> (i32, i32, i32) {
    %c0_i32 = arith.constant 0 : i32
    %c0_i32_0 = arith.constant 0 : i32
    return %arg0, %arg1, %c0_i32 : i32, i32, i32
  }
  func.func @transform_4(%arg0: i32, %arg1: i32) -> (i32, i32, i32) {
    %c0_i32 = arith.constant 0 : i32
    %c0_i32_0 = arith.constant 0 : i32
    return %arg0, %arg1, %c0_i32 : i32, i32, i32
  }
  func.func @transform_5(%arg0: i32, %arg1: i32) -> (i32, i32, i32) {
    %c0_i32 = arith.constant 0 : i32
    %c0_i32_0 = arith.constant 0 : i32
    %c0_i32_1 = arith.constant 0 : i32
    %c0_i32_2 = arith.constant 0 : i32
    return %c0_i32, %c0_i32_0, %c0_i32_1 : i32, i32, i32
  }
  func.func @transform_6(%arg0: i32, %arg1: i32) -> (i32, i32, i32) {
    %c0_i32 = arith.constant 0 : i32
    %c0_i32_0 = arith.constant 0 : i32
    %c0_i32_1 = arith.constant 0 : i32
    %c0_i32_2 = arith.constant 0 : i32
    return %c0_i32, %c0_i32_0, %c0_i32_1 : i32, i32, i32
  }
  func.func @transform_7(%arg0: i32, %arg1: i32) -> (i32, i32) {
    %c0_i32 = arith.constant 0 : i32
    %c0_i32_0 = arith.constant 0 : i32
    %c0_i32_1 = arith.constant 0 : i32
    return %c0_i32, %c0_i32_0 : i32, i32
  }
  func.func @transform_8(%arg0: i32, %arg1: i32) -> (i32, i32) {
    %c0_i32 = arith.constant 0 : i32
    %c0_i32_0 = arith.constant 0 : i32
    %c0_i32_1 = arith.constant 0 : i32
    return %c0_i32, %c0_i32_0 : i32, i32
  }
  func.func @transform_9(%arg0: i32, %arg1: i32) -> (i32, i32) {
    %c0_i32 = arith.constant 0 : i32
    %c0_i32_0 = arith.constant 0 : i32
    %c0_i32_1 = arith.constant 0 : i32
    return %c0_i32, %c0_i32_0 : i32, i32
  }
  func.func @transform_10(%arg0: i32, %arg1: i32) -> (i32, i32) {
    %c0_i32 = arith.constant 0 : i32
    %c0_i32_0 = arith.constant 0 : i32
    %c0_i32_1 = arith.constant 0 : i32
    return %c0_i32, %c0_i32_0 : i32, i32
  }
  func.func @transform_11(%arg0: i32, %arg1: i32) -> (i32, i32) {
    %c0_i32 = arith.constant 0 : i32
    %c0_i32_0 = arith.constant 0 : i32
    %c0_i32_1 = arith.constant 0 : i32
    return %c0_i32, %c0_i32_0 : i32, i32
  }
  func.func @transform_12(%arg0: i32, %arg1: i32) -> (i32, i32) {
    %c0_i32 = arith.constant 0 : i32
    %c0_i32_0 = arith.constant 0 : i32
    %c0_i32_1 = arith.constant 0 : i32
    return %c0_i32, %c0_i32_0 : i32, i32
  }
  func.func @transform_13(%arg0: i32, %arg1: i32) -> (i32, i32) {
    %c0_i32 = arith.constant 0 : i32
    %c0_i32_0 = arith.constant 0 : i32
    %c0_i32_1 = arith.constant 0 : i32
    return %c0_i32, %c0_i32_0 : i32, i32
  }
  func.func @transform_14(%arg0: i32, %arg1: i32) -> (i32, i32) {
    %c0_i32 = arith.constant 0 : i32
    %c0_i32_0 = arith.constant 0 : i32
    %c0_i32_1 = arith.constant 0 : i32
    return %c0_i32, %c0_i32_0 : i32, i32
  }
  func.func @transform_15(%arg0: i32, %arg1: i32) -> (i32, i32, i32) {
    %c0_i32 = arith.constant 0 : i32
    %c0_i32_0 = arith.constant 0 : i32
    return %arg0, %arg1, %c0_i32 : i32, i32, i32
  }
  func.func @transform_16(%arg0: i32, %arg1: i32) -> (i32, i32, i32, i32) {
    %c0_i32 = arith.constant 0 : i32
    %c0_i32_0 = arith.constant 0 : i32
    %c0_i32_1 = arith.constant 0 : i32
    return %arg0, %c0_i32, %arg1, %c0_i32_0 : i32, i32, i32, i32
  }
}

</mosaic_0001>

<bundles_post_ra>
// kernel: tpu_custom_call.1
= control target key start
LH: loop header
LB: loop body
LE: loop exit
PB: predicated region body
PF: predicated region fallthrough
CT: control target
= control target key end

     0   :  { %s2137_s0 = inlined_call_operand.vmem [shape: f32[2,8,32], index: 0, kind: input, shape index: {}]   ;;  %s2138_s1 = inlined_call_operand.vmem [shape: f32[2,4,8,8], index: 1, kind: input, shape index: {}]   ;;  %s2139_s2 = inlined_call_operand.vmem [shape: f32[2,4,8,8], index: 2, kind: input, shape index: {}]   ;;  %s2140_s3 = inlined_call_operand.vmem [shape: f32[2,8,8], index: 3, kind: input, shape index: {}]   ;;  %s2141_s4 = inlined_call_operand.vmem [shape: f32[2,8,1], index: 4, kind: input, shape index: {}]   ;;  %s2142_s5 = inlined_call_operand.vmem [shape: f32[4,32,8], index: 5, kind: input, shape index: {}]   ;;  %s2143_s6 = inlined_call_operand.vmem [shape: f32[4,8,32], index: 6, kind: input, shape index: {}]   ;;  %s2144_s7 = inlined_call_operand.vmem [shape: f32[1,32], index: 7, kind: input, shape index: {}]   ;;  %s2145_s8 = inlined_call_operand.vmem [shape: f32[1,32], index: 8, kind: input, shape index: {}]   ;;  %s2146_s9 = inlined_call_operand.vmem [shape: f32[32,64], index: 9, kind: input, shape index: {}]   ;;  %s2147_s10 = inlined_call_operand.vmem [shape: f32[1,64], index: 10, kind: input, shape index: {}]   ;;  %s2148_s11 = inlined_call_operand.vmem [shape: f32[64,32], index: 11, kind: input, shape index: {}]   ;;  %s2149_s12 = inlined_call_operand.vmem [shape: f32[1,32], index: 12, kind: input, shape index: {}]   ;;  %s2150_s13 = inlined_call_operand.vmem [shape: f32[1,32], index: 13, kind: input, shape index: {}]   ;;  %s2151_s14 = inlined_call_operand.vmem [shape: f32[1,32], index: 14, kind: input, shape index: {}]   ;;  %s2152_s15 = inlined_call_operand.hbm [shape: f32[2,8,32], index: 15, kind: output, shape index: {0}]   ;;  %s2153_s16 = inlined_call_operand.hbm [shape: f32[2,4,8,8], index: 16, kind: output, shape index: {1}]  }
   0x1   :  { %2161 = sst [smem:[#allocation15_spill]] %s2137_s0 }
   0x2   :  { %2162 = sst [smem:[#allocation16_spill]] %s2138_s1 }
   0x3   :  { %2163 = sst [smem:[#allocation17_spill]] %s2139_s2 }
   0x4   :  { %2164 = sst [smem:[#allocation18_spill]] %s2140_s3 }
   0x5   :  { %2165 = sst [smem:[#allocation19_spill]] %s2141_s4 }
   0x6   :  { %22 = vsyncpa [#allocation3], 0 }
   0x7   :  { %24 = vsyncpa [#allocation3 + $0x1], 0 }
   0x8   :  { %25 = vsyncpa [#allocation5], 0 }
   0x9   :  { %27 = vsyncpa [#allocation5 + $0x1], 0  ;;  %s1812_s21 = smov 0   ;;  %s1814_s22 = smov 0  }
   0xa   :  { %s1816_s23 = smov 0   ;;  %s1818_s24 = smov 0  }
   0xb   :  { %s1820_s25 = smov 0   ;;  %s1822_s26 = smov 0  }
   0xc LB: > { %2166 = sst [smem:[#allocation8_spill]] %s1701_s21  ;;  %s1471_s27 = sadd.s32 4294967295, %s1721_s26   ;;  %s1721_s26 = sphi %s1822_s26, %s33_s26   ;;  %s1717_s25 = sphi %s1820_s25, %s2186_s25   ;;  %s1713_s24 = sphi %s1818_s24, %s2185_s24   ;;  %s1709_s23 = sphi %s1816_s23, %s2184_s23   ;;  %s1705_s22 = sphi %s1814_s22, %s2188_s22   ;;  %s1701_s21 = sphi %s1812_s21, %s2187_s21  }
   0xd   : > { %2167 = sst [smem:[#allocation9_spill]] %s1709_s23  ;;  %s1472_s28 = sadd.s32 4294967294, %s1721_s26  }
   0xe   : > { %2168 = sst [smem:[#allocation10_spill]] %s1717_s25  ;;  %s45_s29 = sadd.s32 1, %s1717_s25 }
   0xf   : > { %2169 = sst [smem:[#allocation11_spill]] %s1721_s26  ;;  %s400_s30 = sadd.s32 1, %s1709_s23 }
  0x10   : > { %p47_p0 = scmp.ge.s32.totalorder %s45_s29, 2  ;;  %p410_p1 = scmp.ne.s32.totalorder %s1709_s23, %s1705_s22 }
  0x11   : > { %p411_p2 = scmp.eq.s32.totalorder %s1471_s27, 1  ;;  %p416_p3 = scmp.ne.s32.totalorder %s1705_s22, %s1701_s21 }
  0x12   : > { %s2190_s29 = smov (%p47_p0, %s45_s29), 0  ;;  %p417_p5 = scmp.eq.s32.totalorder %s1472_s28, 1 }
  0x13   : > { %2170 = sst [smem:[#allocation12_spill]] %s2190_s29  ;;  %p1852_p4 = por %p411_p2, %p410_p1 }
  0x14   : > { %s395_s17 = ssub.s32 %s1717_s25, %s2190_s29  ;;  %p1475_p6 = scmp.ge.s32.totalorder %s1721_s26, 1 }
  0x15   : > { %p398_p7 = scmp.eq.s32.totalorder %s395_s17, 0  ;;  %p1859_p8 = por %p417_p5, %p416_p3 }
  0x16   : > { %p539_p9 = scmp.lt.s32.totalorder %s1721_s26, 3 }
  0x17   : > { %s2172_s18 = scalar_select %p1859_p8, 1, 0 }
  0x18   : > { %s1865_s19 = scalar_select %p398_p7, %s1709_s23, %s400_s30  }
  0x19   : > { %2173 = sst [smem:[#allocation13_spill]] %s2172_s18  ;;  %p540_p10 = pnand %p1475_p6, %p539_p9 }
  0x1a   : > { %2174 = sst [smem:[#allocation14_spill]] %s1865_s19  ;;  %p620_p11 = scmp.lt.s32.totalorder (!%p540_p10), %s1713_s24, 1 }
  0x1b   : > { %543 = sbr.rel (%p540_p10) target bundleno = 1651 (0x673), region = 80  ;;  %s2175_s29 = sld [smem:[#allocation15_spill]] (!%p540_p10) }
  0x1c   : > { %s2176_s1 = sld [smem:[#allocation16_spill]] (!%p540_p10)  ;;  %s1978_s18 = sand.u32 (!%p540_p10), 1, %s1705_s22  }
  0x1d   : > { %s2177_s3 = sld [smem:[#allocation18_spill]] (!%p540_p10)  ;;  %s1477_s21 = sshll.u32 (!%p540_p10), %s1978_s18, 5 }
  0x1e   : > { %s2178_s2 = sld [smem:[#allocation17_spill]] (!%p540_p10) }
  0x1f   : > { %s2179_s4 = sld [smem:[#allocation19_spill]] (!%p540_p10) }
  0x20   : > { %s1869_s20 = scalar_select %p620_p11, %s1713_s24, 1  ;;  %vm662_vm0 = vcmask 261120   ;;  %v1723_v2 = vmov 32.0   ;;  %v705_v14 = vld [vmem:[%s2142_s5 + $0x18] sm:$0xff]  ;;  %v704_v17 = vld [vmem:[%s2142_s5 + $0x10] sm:$0xff]  ;;  %v703_v20 = vld [vmem:[%s2142_s5 + $0x8] sm:$0xff] }
  0x21   : > { %1589 = vrcp.f32 %v1723_v2  ;;  %v709_v15 = vld [vmem:[%s2142_s5 + $0x38] sm:$0xff]  ;;  %733 = vmatpush.msra.mxu0 %v705_v14  ;;  %v708_v18 = vld [vmem:[%s2142_s5 + $0x30] sm:$0xff]  ;;  %v707_v21 = vld [vmem:[%s2142_s5 + $0x28] sm:$0xff]  ;;  %vm801_vm2 = vcmask 64512   ;;  %vm1244_vm9 = vcmask 523264  }
  0x22   : > { %s1872_s27 = sshll.u32 %s1869_s20, 3  ;;  %v717_v16 = vld [vmem:[%s2142_s5 + $0x78] sm:$0xff]  ;;  %753 = vmatpush.msra.mxu2 %v709_v15  ;;  %v716_v19 = vld [vmem:[%s2142_s5 + $0x70] sm:$0xff]  ;;  %v715_v22 = vld [vmem:[%s2142_s5 + $0x68] sm:$0xff] }
  0x23   : > { %s626_s25 = scalar_lea.vmem %s2175_s29, %s1872_s27  ;;  %793 = vmatpush.msra.mxu3 %v717_v16  ;;  %734 = vmatpush.msra.mxu0 %v704_v17  ;;  %v702_v23 = vld [vmem:[%s2142_s5] sm:$0xff]  ;;  %v713_v26 = vld [vmem:[%s2142_s5 + $0x58] sm:$0xff]  ;;  %v712_v27 = vld [vmem:[%s2142_s5 + $0x50] sm:$0xff]  ;;  %s643_s19 = scalar_lea.vmem %s2177_s3, %s1872_s27 }
  0x24   : > { %v1878_v0 = vld [vmem:[%s626_s25] sm:$0xff]  ;;  %754 = vmatpush.msra.mxu2 %v708_v18  ;;  %v711_v28 = vld [vmem:[%s2142_s5 + $0x48] sm:$0xff]  ;;  %s1514_s25 = sshll.u32 %s1869_s20, 5  ;;  %s1982_s20 = scalar_lea.vmem [#allocation4], %s1477_s21 }
  0x25   : > { %v663_v1 = vsel %vm662_vm0, %v1878_v0, 0.0  ;;  %794 = vmatpush.msra.mxu3 %v716_v19  ;;  %v706_v24 = vld [vmem:[%s2142_s5 + $0x20] sm:$0xff]  ;;  %735 = vmatpush.msra.mxu0 %v703_v20  ;;  %s631_s17 = scalar_lea.vmem %s2176_s1, %s1514_s25  ;;  %s636_s23 = scalar_lea.vmem %s2178_s2, %s1514_s25 }
  0x26   : > { %664 = vadd.xlane.f32.xlu0 %v663_v1  ;;  %755 = vmatpush.msra.mxu2 %v707_v21  ;;  %v714_v25 = vld [vmem:[%s2142_s5 + $0x60] sm:$0xff]  ;;  %v653_v46 = vld [vmem:[%s631_s17 + $0x8] sm:$0xff]  ;;  %v655_v47 = vld [vmem:[%s631_s17 + $0x18] sm:$0xff]  ;;  %s650_s26 = scalar_lea.vmem %s2179_s4, %s1872_s27  ;;  %s1305_s27 = sshll.u32 %s1982_s20, 4  ;;  %s1306_s27 = int_to_ptr.vmem [resolvable:$true] %s1305_s27 }
  0x27   : > { %v1590_v3 = vpop.eup %1589  ;;  %795 = vmatpush.msra.mxu3 %v715_v22  ;;  %736 = vmatpush.msra.mxu0 %v702_v23  ;;  %v710_v31 = vld [vmem:[%s2142_s5 + $0x40] sm:$0xff]  ;;  %v654_v48 = vld [vmem:[%s631_s17 + $0x10] sm:$0xff]  ;;  %s1516_s29 = sshll.u32 %s1713_s24, 5 }
  0x28   : > { %v667_v4 = vmul.f32 32.0, %v1590_v3  ;;  %vm671_vm1 = vweird.f32 %v1590_v3  ;;  %756 = vmatpush.msra.mxu2 %v706_v24  ;;  %v652_v33 = vld [vmem:[%s631_s17] sm:$0xff]  ;;  %1491 = vmatpush.xpose.msk.msra.mxu1 %vm801_vm2, %v653_v46  ;;  %s1304_s28 = scalar_lea.hbm %s2153_s16, %s1516_s29 }
  0x29   : > { %796 = vmatpush.msra.mxu3 %v714_v25  ;;  %1489 = vmatpush.xpose.msk.msrb.mxu0 %vm801_vm2, %v652_v33  ;;  %v1583_v40 = vld [vmem:[%s2144_s7] ss:$0 sm:$0xff]  ;;  %s1307_s17 = sshll.u32 %s1304_s28, 4  ;;  %s1308_s17 = int_to_ptr.hbm [resolvable:$true] %s1307_s17 }
  0x2a   : > { %v668_v5 = vsub.f32 1.0, %v667_v4  ;;  %773 = vmatpush.msrb.mxu2 %v713_v26  ;;  %v1584_v43 = vld [vmem:[%s2145_s8] ss:$0 sm:$0xff]  ;;  %v658_v26 = vld [vmem:[%s636_s23 + $0x10] sm:$0xff]  ;;  %s1625_s21 = sshra.s32 %s1308_s17, 4  ;;  %s1626_s21 = int_to_ptr.hbm [resolvable:$true] %s1625_s21 }
  0x2b   : > { %1495 = vmatpush.xpose.msk.msrb.mxu3 %vm801_vm2, %v655_v47  ;;  %v660_v53 = vld [vmem:[%s643_s19] sm:$0xff]  ;;  %s1627_s25 = scalar_lea.hbm %s1626_s21, 32  ;;  %p1632_p1 = scmp.lt.s32.totalorder %s1626_s21, %s2153_s16 }
  0x2c   : > { %v669_v6 = vmul.f32 %v1590_v3, %v668_v5  ;;  %774 = vmatpush.msrb.mxu2 %v712_v27  ;;  %v656_v24 = vld [vmem:[%s636_s23] sm:$0xff]  ;;  %p1628_p12 = scmp.ne.s32.totalorder %s1626_s21, %s1627_s25 }
  0x2e   : > { %v670_v7 = vadd.f32 %v1590_v3, %v669_v6  ;;  %775 = vmatpush.msrb.mxu2 %v711_v28  ;;  %p1629_p13 = pnand %p1628_p12, %p1852_p4 }
  0x30   : > { %v1882_v8 = vsel %vm671_vm1, %v1590_v3, %v670_v7  ;;  %776 = vmatpush.msrb.mxu2 %v710_v31  ;;  %v657_v31 = vld [vmem:[%s636_s23 + $0x8] sm:$0xff]  ;;  %p1630_p0 = pneg %p1629_p13 }
  0x31   : > { %1007 = vmatpush.msrb.mxu1 %v657_v31 }
  0x99   : > { %v665_v9 = vpop.xlane.xlu0 %664 }
  0x9a   : > { %v673_v10 = vmul.f32 %v1882_v8, %v665_v9 }
  0x9c   : > { %v674_v11 = vsub.f32 %v1878_v0, %v673_v10 }
  0x9e   : > { %v675_v12 = vmul.f32 %v674_v11, %v674_v11 }
  0xa0   : > { %v676_v13 = vsel %vm662_vm0, %v675_v12, 0.0 }
  0xa1   : > { %677 = vadd.xlane.f32.xlu0 %v676_v13 }
 0x114   : > { %v678_v29 = vpop.xlane.xlu0 %677 }
 0x115   : > { %v679_v30 = vmul.f32 %v678_v29, %v1882_v8 }
 0x117   : > { %v680_v32 = vadd.f32 1e-06, %v679_v30  ;;  %v659_v30 = vld [vmem:[%s636_s23 + $0x18] sm:$0xff]  ;;  %s1277_s23 = scalar_lea.sflag [#allocation5], %s1978_s18 }
 0x119   : > { %1591 = vrsqrt.f32 %v680_v32  ;;  %vm687_vm4 = vweird.f32 %v680_v32 }
 0x11f   : > { %v1592_v34 = vpop.eup %1591 }
 0x120   : > { %v682_v35 = vmul.f32 %v1592_v34, %v680_v32  ;;  %vm688_vm3 = vweird.f32 %v1592_v34 }
 0x121   : > { %vm689_vm5 = vmor %vm687_vm4, %vm688_vm3 }
 0x122   : > { %v683_v36 = vmul.f32 %v1592_v34, %v682_v35 }
 0x124   : > { %v684_v37 = vmul.f32 0.5, %v683_v36 }
 0x126   : > { %v685_v38 = vsub.f32 1.5, %v684_v37 }
 0x128   : > { %v686_v39 = vmul.f32 %v1592_v34, %v685_v38 }
 0x12a   : > { %v690_v41 = vsel %vm689_vm5, %v1592_v34, %v686_v39 }
 0x12b   : > { %v691_v42 = vmul.f32 %v690_v41, %v674_v11 }
 0x12d   : > { %v696_v44 = vmul.f32 %v1583_v40, %v691_v42 }
 0x12f   : > { %v701_v45 = vadd.f32 %v1584_v43, %v696_v44 }
 0x131   : > { %1485 = vmatmul.msk.f32.vlgmr.msra.gmra.mxu0 %vm662_vm0, %v701_v45  ;;  %1486 = vmatmul.msk.f32.vlgmr.msra.gmra.mxu2 %vm662_vm0, %v701_v45 }
 0x132   : > { %1488 = vmatmul.msk.f32.vlgmr.msra.gmra.mxu3 %vm662_vm0, %v701_v45  ;;  %1493 = vmatpush.xpose.msk.msra.mxu2 %vm801_vm2, %v654_v48 }
 0x133   : > { %984 = vmatpush.msra.mxu0 %v656_v24  ;;  %1053 = vmatpush.msra.mxu3 %v659_v30  ;;  %v1238_v24 = vld [vmem:[%s2148_s11 + $0x30] sm:$0xff]  ;;  %v1235_v30 = vld [vmem:[%s2148_s11 + $0x18] sm:$0xff] }
 0x139   : > { %1487 = vmatmul.msk.f32.vlgmr.msrb.gmra.mxu2 %vm662_vm0, %v701_v45 }
 0x13a   : > { %1030 = vmatpush.msrb.mxu2 %v658_v26 }
 0x1ae   : > { %v738_v49 = vpop.f32.mrf.mxu0 }
 0x1af   : > { %1490 = vmatmul.msk.f32.vlgmr.msrb.gmra.mxu0 %vm801_vm2, %v738_v49 }
 0x1b4   : > { %v758_v50 = vpop.f32.mrf.mxu2 }
 0x1b5   : > { %v798_v51 = vpop.f32.mrf.mxu3  ;;  %1492 = vmatmul.msk.f32.vlgmr.msra.gmra.mxu1 %vm801_vm2, %v758_v50 }
 0x1b6   : > { %1496 = vmatmul.msk.f32.vlgmr.msrb.gmra.mxu3 %vm801_vm2, %v798_v51 }
 0x1bc   : > { %v778_v52 = vpop.f32.mrf.mxu2 }
 0x1bd   : > { %1494 = vmatmul.msk.f32.vlgmr.msra.gmra.mxu2 %vm801_vm2, %v778_v52  ;;  %v1058_v52 = vld [vmem:[%s2143_s6] sm:$0xff] }
 0x1be   : > { %1080 = vmatpush.msrb.mxu0 %v1058_v52 }
 0x22c   : > { %v825_v54 = vpop.f32.mrf.mxu0 }
 0x22d   : > { %v826_v55 = vadd.f32 %v825_v54, %v660_v53  ;;  %v1061_v54 = vld [vmem:[%s2143_s6 + $0x18] sm:$0xff] }
 0x22e   : > { %1149 = vmatpush.msrb.mxu3 %v1061_v54 }
 0x22f   : > { %v906_v56 = vsel %vm801_vm2, %v826_v55, -inf }
 0x230   : > { %907 = vmax.xlane.f32.xlu2 %v906_v56 }
 0x232   : > { %v851_v57 = vpop.f32.mrf.mxu1 }
 0x233   : > { %v852_v58 = vadd.f32 %v851_v57, %v660_v53  ;;  %v661_v57 = vld [vmem:[%s650_s26] sm:$0xff] }
 0x235   : > { %v909_v59 = vsel %vm801_vm2, %v852_v58, -inf }
 0x238   : > { %910 = vmax.xlane.f32.xlu2 %v909_v59 }
 0x239   : > { %v903_v63 = vpop.f32.mrf.mxu3 }
 0x23a   : > { %v904_v1 = vadd.f32 %v903_v63, %v660_v53 }
 0x23c   : > { %v915_v2 = vsel %vm801_vm2, %v904_v1, -inf }
 0x240   : > { %v877_v60 = vpop.f32.mrf.mxu2 }
 0x241   : > { %v878_v61 = vadd.f32 %v877_v60, %v660_v53  ;;  %v1060_v53 = vld [vmem:[%s2143_s6 + $0x10] sm:$0xff] }
 0x242   : > { %1126 = vmatpush.msra.mxu2 %v1060_v53 }
 0x243   : > { %v912_v62 = vsel %vm801_vm2, %v878_v61, -inf }
 0x244   : > { %913 = vmax.xlane.f32.xlu1 %v912_v62 }
 0x24c   : > { %916 = vmax.xlane.f32.xlu1 %v915_v2 }
 0x2a3   : > { %v908_v3 = vpop.xlane.xlu2 %907 }
 0x2a4   : > { %v918_v4 = vsub.f32 %v826_v55, %v908_v3  ;;  %v1059_v55 = vld [vmem:[%s2143_s6 + $0x8] sm:$0xff] }
 0x2a5   : > { %1103 = vmatpush.msra.mxu1 %v1059_v55 }
 0x2a6   : > { %v922_v5 = vmul.f32 1.442695, %v918_v4 }
 0x2a8   : > { %1593 = vpow2.f32 %v922_v5 }
 0x2ab   : > { %v911_v9 = vpop.xlane.xlu2 %910 }
 0x2ac   : > { %v919_v12 = vsub.f32 %v852_v58, %v911_v9  ;;  %v1724_v58 = vmov 0  }
 0x2ad   : > { %1581 = vset.pattern.permute.xlu1 %v1724_v58  ;;  %1582 = vset.pattern.permute.xlu0 %v1724_v58 }
 0x2ae   : > { %v1594_v6 = vpop.eup %1593  ;;  %v924_v14 = vmul.f32 1.442695, %v919_v12 }
 0x2af   : > { %v930_v7 = vsel %vm801_vm2, %v1594_v6, 0.0 }
 0x2b0   : > { %931 = vadd.xlane.f32.xlu2 %v930_v7 }
 0x2b7   : > { %v914_v10 = vpop.xlane.xlu1 %913 }
 0x2b8   : > { %v920_v11 = vsub.f32 %v878_v61, %v914_v10 }
 0x2ba   : > { %v926_v13 = vmul.f32 1.442695, %v920_v11 }
 0x2bc   : > { %1595 = vpow2.f32 %v926_v13 }
 0x2bd   : > { %1597 = vpow2.f32 %v924_v14 }
 0x2bf   : > { %v917_v15 = vpop.xlane.xlu1 %916 }
 0x2c0   : > { %v921_v16 = vsub.f32 %v904_v1, %v917_v15 }
 0x2c2   : > { %v1596_v17 = vpop.eup %1595  ;;  %v928_v18 = vmul.f32 1.442695, %v921_v16 }
 0x2c3   : > { %v936_v19 = vsel %vm801_vm2, %v1596_v17, 0.0  ;;  %v1598_v20 = vpop.eup %1597 }
 0x2c4   : > { %1599 = vpow2.f32 %v928_v18  ;;  %937 = vadd.xlane.f32.xlu0 %v936_v19  ;;  %v933_v23 = vsel %vm801_vm2, %v1598_v20, 0.0 }
 0x2ca   : > { %v1600_v21 = vpop.eup %1599 }
 0x2cb   : > { %v939_v22 = vsel %vm801_vm2, %v1600_v21, 0.0 }
 0x2cc   : > { %940 = vadd.xlane.f32.xlu1 %v939_v22  ;;  %934 = vadd.xlane.f32.xlu0 %v933_v23  ;;  %v1200_v22 = vld [vmem:[%s2146_s9] sm:$0xff]  ;;  %v1239_v23 = vld [vmem:[%s2148_s11 + $0x38] sm:$0xff] }
 0x2e5   : > { %1164 = vperm.xlu1 %1581, %v661_v57  }
 0x323   : > { %v932_v25 = vpop.xlane.xlu2 %931 }
 0x324   : > { %1601 = vrcp.f32 %v932_v25 }
 0x32a   : > { %v1602_v27 = vpop.eup %1601 }
 0x32b   : > { %v946_v28 = vmul.f32 %v1602_v27, %v932_v25  ;;  %v1237_v25 = vld [vmem:[%s2148_s11 + $0x28] sm:$0xff] }
 0x32d   : > { %v950_v29 = vsub.f32 2.0, %v946_v28  ;;  %v1236_v28 = vld [vmem:[%s2148_s11 + $0x20] sm:$0xff] }
 0x32f   : > { %v954_v32 = vmul.f32 %v1602_v27, %v950_v29 }
 0x331   : > { %v958_v33 = vmul.f32 %v1594_v6, %v954_v32 }
 0x333   : > { %1497 = vmatmul.msk.f32.vlgmr.msra.gmra.mxu0 %vm801_vm2, %v958_v33  ;;  %962 = vst.msk [vmem:[%s1982_s20] sm:$0xff] %vm801_vm2, %v958_v33 }
 0x337   : > { %v938_v34 = vpop.xlane.xlu0 %937 }
 0x338   : > { %1603 = vrcp.f32 %v938_v34 }
 0x33e   : > { %v1604_v35 = vpop.eup %1603 }
 0x33f   : > { %v948_v36 = vmul.f32 %v1604_v35, %v938_v34  ;;  %v941_v37 = vpop.xlane.xlu1 %940  ;;  %v935_v38 = vpop.xlane.xlu0 %934 }
 0x340   : > { %1605 = vrcp.f32 %v941_v37 }
 0x341   : > { %v952_v39 = vsub.f32 2.0, %v948_v36  ;;  %1607 = vrcp.f32 %v935_v38  ;;  %v1585_v36 = vld [vmem:[%s2150_s13] ss:$0 sm:$0xff] }
 0x343   : > { %v956_v40 = vmul.f32 %v1604_v35, %v952_v39  ;;  %v1586_v39 = vld [vmem:[%s2151_s14] ss:$0 sm:$0xff] }
 0x345   : > { %v960_v41 = vmul.f32 %v1596_v17, %v956_v40 }
 0x346   : > { %v1606_v42 = vpop.eup %1605 }
 0x347   : > { %v1608_v43 = vpop.eup %1607  ;;  %v949_v44 = vmul.f32 %v1606_v42, %v941_v37  ;;  %1499 = vmatmul.msk.f32.vlgmr.msrb.gmra.mxu2 %vm801_vm2, %v960_v41  ;;  %964 = vst.msk [vmem:[%s1982_s20 + $0x10] sm:$0xff] %vm801_vm2, %v960_v41 }
 0x348   : > { %v947_v45 = vmul.f32 %v1608_v43, %v935_v38 }
 0x349   : > { %v953_v46 = vsub.f32 2.0, %v949_v44  ;;  %v1232_v44 = vld [vmem:[%s2148_s11] sm:$0xff] }
 0x34a   : > { %v951_v47 = vsub.f32 2.0, %v947_v45  ;;  %v1587_v45 = vld [vmem:[%s2147_s10] ss:$0 sm:$0xff] }
 0x34b   : > { %v957_v48 = vmul.f32 %v1606_v42, %v953_v46  ;;  %v1234_v42 = vld [vmem:[%s2148_s11 + $0x10] sm:$0xff] }
 0x34c   : > { %v955_v49 = vmul.f32 %v1608_v43, %v951_v47  ;;  %v1233_v43 = vld [vmem:[%s2148_s11 + $0x8] sm:$0xff] }
 0x34d   : > { %v961_v50 = vmul.f32 %v1600_v21, %v957_v48  ;;  %v1201_v21 = vld [vmem:[%s2146_s9 + $0x8] sm:$0xff] }
 0x34e   : > { %v959_v51 = vmul.f32 %v1598_v20, %v955_v49  ;;  %v1202_v20 = vld [vmem:[%s2146_s9 + $0x10] sm:$0xff] }
 0x34f   : > { %1500 = vmatmul.msk.f32.vlgmr.msra.gmra.mxu3 %vm801_vm2, %v961_v50  ;;  %965 = vst.msk [vmem:[%s1982_s20 + $0x18] sm:$0xff] %vm801_vm2, %v961_v50 }
 0x350   : > { %1498 = vmatmul.msk.f32.vlgmr.msrb.gmra.mxu1 %vm801_vm2, %v959_v51  ;;  %963 = vst.msk [vmem:[%s1982_s20 + $0x8] sm:$0xff] %vm801_vm2, %v959_v51  ;;  %s1631_s20 = scalar_lea.hbm %s2153_s16, 64 }
 0x351   : > { %1256 = vmatpush.msrb.mxu1 %v1239_v23  ;;  %p1633_p2 = scmp.lt.s32.totalorder %s1631_s20, %s1627_s25 }
 0x353   : > { %1257 = vmatpush.msrb.mxu1 %v1238_v24  ;;  %p1634_p3 = por %p1633_p2, %p1632_p1 }
 0x355   : > { %1258 = vmatpush.msrb.mxu1 %v1237_v25  ;;  %p1635_p5 = pnand %p1634_p3, %p1630_p0 }
 0x357   : > { %v2019_v11 = vpop.permute.xlu1 %1164  ;;  %1259 = vmatpush.msrb.mxu1 %v1236_v28 }
 0x359   : > { %1260 = vmatpush.msrb.mxu1 %v1235_v30 }
 0x35b   : > { %1261 = vmatpush.msrb.mxu1 %v1234_v42 }
 0x35d   : > { %1262 = vmatpush.msrb.mxu1 %v1233_v43 }
 0x35f   : > { %1263 = vmatpush.msrb.mxu1 %v1232_v44 }
 0x3b0   : > { %v986_v56 = vpop.f32.mrf.mxu0 }
 0x3b1   : > { %1501 = vmatmul.msk.f32.vlgmr.msrb.gmra.mxu0 %vm801_vm2, %v986_v56 }
 0x3ca   : > { %v1032_v59 = vpop.f32.mrf.mxu2 }
 0x3cb   : > { %1503 = vmatmul.msk.f32.vlgmr.msra.gmra.mxu2 %vm801_vm2, %v1032_v59 }
 0x3cd   : > { %v1009_v60 = vpop.f32.mrf.mxu1 }
 0x3ce   : > { %1502 = vmatmul.msk.f32.vlgmr.msra.gmra.mxu1 %vm801_vm2, %v1009_v60 }
 0x3d2   : > { %v1055_v61 = vpop.f32.mrf.mxu3 }
 0x3d3   : > { %1504 = vmatmul.msk.f32.vlgmr.msrb.gmra.mxu3 %vm801_vm2, %v1055_v61 }
 0x42e   : > { %v1082_v63 = vpop.f32.mrf.mxu0 }
 0x42f   : > { %v1154_v3 = vsel %vm662_vm0, %v1082_v63, 0.0 }
 0x44b   : > { %v1105_v62 = vpop.f32.mrf.mxu1 }
 0x44c   : > { %v1155_v2 = vsel %vm662_vm0, %v1105_v62, 0.0 }
 0x44d   : > { %v1156_v5 = vadd.f32 %v1155_v2, %v1154_v3 }
 0x44e   : > { %v1128_v1 = vpop.f32.mrf.mxu2 }
 0x44f   : > { %v1157_v4 = vsel %vm662_vm0, %v1128_v1, 0.0 }
 0x450   : > { %v1158_v6 = vadd.f32 %v1157_v4, %v1156_v5 }
 0x456   : > { %v1151_v7 = vpop.f32.mrf.mxu3 }
 0x457   : > { %v1159_v9 = vsel %vm662_vm0, %v1151_v7, 0.0 }
 0x458   : > { %v1160_v10 = vadd.f32 %v1159_v9, %v1158_v6 }
 0x45a   : > { %v1161_v12 = vadd.f32 %v1160_v10, %v1878_v0  ;;  %v1203_v0 = vld [vmem:[%s2146_s9 + $0x18] sm:$0xff] }
 0x45b   : > { %1223 = vmatpush.msra.mxu0 %v1203_v0 }
 0x45c   : > { %v2023_v13 = vmul.f32 %v2019_v11, %v1161_v12 }
 0x45d   : > { %1224 = vmatpush.msra.mxu0 %v1202_v20 }
 0x45e   : > { %v1168_v14 = vsel %vm662_vm0, %v2023_v13, 0.0 }
 0x45f   : > { %1169 = vadd.xlane.f32.xlu2 %v1168_v14  ;;  %1225 = vmatpush.msra.mxu0 %v1201_v21 }
 0x461   : > { %1226 = vmatpush.msra.mxu0 %v1200_v22 }
 0x4d2   : > { %v1170_v15 = vpop.xlane.xlu2 %1169 }
 0x4d3   : > { %v1171_v16 = vmul.f32 %v1170_v15, %v1882_v8 }
 0x4d5   : > { %v1172_v17 = vsub.f32 %v2023_v13, %v1171_v16 }
 0x4d7   : > { %v1173_v18 = vmul.f32 %v1172_v17, %v1172_v17 }
 0x4d9   : > { %v1174_v19 = vsel %vm662_vm0, %v1173_v18, 0.0 }
 0x4da   : > { %1175 = vadd.xlane.f32.xlu0 %v1174_v19 }
 0x54d   : > { %v1176_v26 = vpop.xlane.xlu0 %1175 }
 0x54e   : > { %v1177_v27 = vmul.f32 %v1176_v26, %v1882_v8 }
 0x550   : > { %v1178_v29 = vadd.f32 1e-06, %v1177_v27 }
 0x552   : > { %1609 = vrsqrt.f32 %v1178_v29  ;;  %vm1185_vm7 = vweird.f32 %v1178_v29 }
 0x558   : > { %v1610_v31 = vpop.eup %1609 }
 0x559   : > { %v1180_v32 = vmul.f32 %v1610_v31, %v1178_v29  ;;  %vm1186_vm6 = vweird.f32 %v1610_v31 }
 0x55a   : > { %vm1187_vm8 = vmor %vm1185_vm7, %vm1186_vm6 }
 0x55b   : > { %v1181_v33 = vmul.f32 %v1610_v31, %v1180_v32 }
 0x55d   : > { %v1182_v34 = vmul.f32 0.5, %v1181_v33 }
 0x55f   : > { %v1183_v35 = vsub.f32 1.5, %v1182_v34 }
 0x561   : > { %v1184_v8 = vmul.f32 %v1610_v31, %v1183_v35 }
 0x563   : > { %v1188_v37 = vsel %vm1187_vm8, %v1610_v31, %v1184_v8 }
 0x564   : > { %v1189_v38 = vmul.f32 %v1188_v37, %v1172_v17 }
 0x566   : > { %v1194_v40 = vmul.f32 %v1585_v36, %v1189_v38 }
 0x568   : > { %v1199_v41 = vadd.f32 %v1586_v39, %v1194_v40 }
 0x56a   : > { %1505 = vmatmul.msk.f32.vlgmr.msra.gmra.mxu0 %vm662_vm0, %v1199_v41 }
 0x5e7   : > { %v1228_v46 = vpop.f32.mrf.mxu0 }
 0x5e8   : > { %v1229_v47 = vadd.f32 %v1587_v45, %v1228_v46 }
 0x5ea   : > { %v1231_v48 = vmax.f32 %v1229_v47, 0.0 }
 0x5ec   : > { %1506 = vmatmul.msk.f32.vlgmr.msrb.gmra.mxu1 %vm1244_vm9, %v1231_v48 }
 0x5ed   : > { %1638 = shalt.err (!%p1635_p5)
}
 0x5ee   : > { %s1725_s29 = smov 128   ;;  %s1726_s30 = smov 8   ;;  %v1588_v49 = vld [vmem:[%s2149_s12] ss:$0 sm:$0xff] }
 0x5ef   : > { %1518 = dma.vmem_to_hbm [thread:$0]  (%p1852_p4), %s1306_s27, 512, %s1308_s17, %s1277_s23, %s1725_s29, %s1725_s29, %s1726_s30  }
 0x5f0   : > { %s1476_s19 = sshll.u32 %s1978_s18, 3  ;;  %s1509_s28 = sshll.u32 %s1713_s24, 3 }
 0x5f1   : > { %s1288_s21 = scalar_lea.hbm %s2152_s15, %s1509_s28  ;;  %s612_s25 = scalar_lea.vmem [#allocation2], %s1476_s19 }
 0x5f2   : > { %s1290_s20 = sshll.u32 %s612_s25, 4  ;;  %s1292_s4 = sshll.u32 %s1288_s21, 4  ;;  %s1291_s20 = int_to_ptr.vmem [resolvable:$true] %s1290_s20  ;;  %s1293_s4 = int_to_ptr.hbm [resolvable:$true] %s1292_s4 }
 0x5f3   : > { %s1272_s24 = scalar_lea.sflag [#allocation3], %s1978_s18  ;;  %s1653_s27 = sshra.s32 %s1293_s4, 4  ;;  %s1654_s27 = int_to_ptr.hbm [resolvable:$true] %s1653_s27 }
 0x5f4   : > { %s1655_s17 = scalar_lea.hbm %s1654_s27, 8  ;;  %s1659_s30 = scalar_lea.hbm %s2152_s15, 16 }
 0x5f5   : > { %p1656_p6 = scmp.ne.s32.totalorder %s1654_s27, %s1655_s17  ;;  %p1660_p10 = scmp.lt.s32.totalorder %s1654_s27, %s2152_s15 }
 0x5f6   : > { %p1661_p11 = scmp.lt.s32.totalorder %s1659_s30, %s1655_s17 }
 0x5f7   : > { %p1657_p7 = pnand %p1656_p6, %p1852_p4 }
 0x5f8   : > { %p1662_p12 = por %p1661_p11, %p1660_p10 }
 0x5f9   : > { %p1658_p9 = pneg %p1657_p7 }
 0x5fb   : > { %p1663_p13 = pnand %p1662_p12, %p1658_p9 }
 0x669   : > { %v1265_v50 = vpop.f32.mrf.mxu1 }
 0x66a   : > { %v1266_v51 = vadd.f32 %v1588_v49, %v1265_v50 }
 0x66c   : > { %v1268_v52 = vadd.f32 %v1266_v51, %v2023_v13 }
 0x66e   : > { %v1269_v53 = vmul.f32 %v1268_v52, %v2019_v11 }
 0x670   : > { %1270 = vst.msk [vmem:[%s612_s25] sm:$0xff] %vm662_vm0, %v1269_v53 }
 0x671   : > { %1666 = shalt.err (!%p1663_p13)
}
 0x672   : > { %1517 = dma.vmem_to_hbm [thread:$0]  (%p1852_p4), %s1291_s20, 128, %s1293_s4, %s1272_s24  }
 0x673 PF: > { %s2180_s18 = sld [smem:[#allocation11_spill]] }
 0x674   : > { %s2181_s1 = sld [smem:[#allocation8_spill]] }
 0x679   : > { %p1528_p0 = scmp.ge.s32.totalorder %s2180_s18, 2 }
 0x67a   : > { %s1322_s2 = sand.u32 1, %s2181_s1  }
 0x67b   : > { %p1522_p1 = pnand %p1528_p0, %p1859_p8  ;;  %s1323_s3 = scalar_lea.sflag [#allocation3], %s1322_s2 }
 0x67d   : > { %p1523_p2 = pneg %p1522_p1 }
 0x67f   : > { %1692 = dma.done.wait (%p1523_p2), %s1323_s3, 128  }
 0x680   : > { %1694 = vsyncadd (%p1523_p2), %s1323_s3, 4294967168  ;;  %s1333_s21 = scalar_lea.sflag [#allocation5], %s1322_s2 }
 0x681   : > { %1696 = dma.done.wait (%p1523_p2), %s1333_s21, 512  }
 0x682   : > { %1698 = vsyncadd (%p1523_p2), %s1333_s21, 4294966784  ;;  %s33_s26 = sadd.s32 1, %s2180_s18   ;;  %s2183_s4 = sld [smem:[#allocation9_spill]] }
 0x683   : > { %p30_p3 = scmp.ge.s32.totalorder %s33_s26, 4   ;;  %s2184_s23 = sld [smem:[#allocation14_spill]] }
 0x684   : > { %s2185_s24 = sld [smem:[#allocation10_spill]]  ;;  %s2187_s21 = smov %s1705_s22 }
 0x685   : > { %s2186_s25 = sld [smem:[#allocation12_spill]]  ;;  %32 = sbr.rel (!%p30_p3) target bundleno = 12 (0xc), region = 144 }
 0x688   : > { %s2188_s22 = smov %s2183_s4 }
 0x68a   :  { %1339 = vsyncpa [#allocation3], 1 }
 0x68b   :  { %1341 = vsyncpa [#allocation3 + $0x1], 1 }
 0x68c   :  { %1342 = vsyncpa [#allocation5], 1 }
 0x68d   :  { %1344 = vsyncpa [#allocation5 + $0x1], 1 }

</bundles_post_ra>
